<compile_context>
chip_gen: v7x
topology: tpu7x:2x2x1
jax: 0.10.0
libtpu: 0.0.40
codegen_flags: <defaults>
</compile_context>

<pallas_src>
import functools

import jax
import jax.numpy as jnp
from jax import lax
from jax.experimental import pallas as pl
from jax.experimental.pallas import tpu as pltpu


def _round_up(x, m):
    return (x + m - 1) // m * m


def _vmem_limit_bytes():
    """Generation-aware scoped-VMEM limit: ~3/4 of physical VMEM, capped at
    100 MiB (v5e/v6e: 128 MiB physical; v7x: 64 MiB per TensorCore)."""
    try:
        cap = int(pltpu.get_tpu_info().vmem_capacity_bytes)
    except Exception:
        cap = 64 * 1024 * 1024
    return int(min(cap * 3 // 4, 100 * 1024 * 1024))


# V_pad at or below this uses the MXU count-matrix path; above it the
# scalar-indexed row-gather path (cost independent of V) is used.
_COUNTS_VOCAB_LIMIT = 2048


def _project_and_logsoftmax(hidden_sum, wt_ref, out_ref, valid_v):
    """hidden_sum: (B_pad, D) f32 in registers (sum of context embeddings);
    wt_ref: (D, V_pad) f32 VMEM (pre-transposed Linear weight, 1/C folded in);
    out_ref: (B_pad, V_pad) f32 VMEM."""
    V_pad = wt_ref.shape[1]
    # Plain (B_pad, D) @ (D, V_pad) contraction -- weight already lane-dense.
    logits = jnp.dot(hidden_sum, wt_ref[...], preferred_element_type=jnp.float32)

    if valid_v != V_pad:  # static: skip the mask entirely when V % 128 == 0
        col = lax.broadcasted_iota(jnp.int32, logits.shape, 1)
        logits = jnp.where(col < valid_v, logits, -1e30)

    # Numerically-stable log-softmax over the vocab axis.
    m = jnp.max(logits, axis=1, keepdims=True)
    shifted = logits - m
    lse = jnp.log(jnp.sum(jnp.exp(shifted), axis=1, keepdims=True))
    out_ref[...] = shifted - lse                  # lane-dense (8k, 128k) store


def _cbow_kernel_counts(idx_ref, emb_ref, wt_ref, out_ref, *, valid_v):
    """Small-vocab path.
       idx_ref: (B_pad, C)     int32, VMEM (token ids, padded rows are 0)
       emb_ref: (V_pad, D)     f32,   VMEM (embedding table, zero-padded rows)
       wt_ref:  (D, V_pad)     f32,   VMEM (pre-transposed Linear weight * 1/C)
       out_ref: (B_pad, V_pad) f32,   VMEM (log-probs, padded)"""
    B_pad, C = idx_ref.shape
    V_pad, _ = emb_ref.shape

    idx = idx_ref[...]                                            # (B_pad, C)
    col = lax.broadcasted_iota(jnp.int32, (B_pad, V_pad), 1)
    counts = jnp.zeros((B_pad, V_pad), jnp.float32)
    for c in range(C):                                            # static, small
        counts = counts + (col == idx[:, c : c + 1]).astype(jnp.float32)

    # Sum of context embeddings per row on the MXU: (B_pad,V_pad)@(V_pad,D).
    hidden_sum = jnp.dot(counts, emb_ref[...], preferred_element_type=jnp.float32)
    _project_and_logsoftmax(hidden_sum, wt_ref, out_ref, valid_v)


def _cbow_kernel_gather(idx_ref, emb_ref, wt_ref, out_ref, *, valid_v, valid_b):
    """Large-vocab path (cost independent of V).
       idx_ref: (B_pad, C)     int32, SMEM
       emb_ref: (V_pad, D)     f32,   VMEM
       wt_ref:  (D, V_pad)     f32,   VMEM
       out_ref: (B_pad, V_pad) f32,   VMEM"""
    B_pad, C = idx_ref.shape
    _, D = emb_ref.shape

    rows = []
    for b in range(valid_b):                       # only the valid batch rows
        def ctx_body(c, acc, b=b):
            tok = idx_ref[b, c]                    # scalar read from SMEM
            return acc + emb_ref[pl.ds(tok, 1), :] # dynamic (1, D) row load
        rows.append(
            lax.fori_loop(0, C, ctx_body, jnp.zeros((1, D), jnp.float32),
                          unroll=True))
    if B_pad > valid_b:                            # padded rows: explicit zeros
        rows.append(jnp.zeros((B_pad - valid_b, D), jnp.float32))

    hidden_sum = jnp.concatenate(rows, axis=0)     # (B_pad, D), stays in vregs
    _project_and_logsoftmax(hidden_sum, wt_ref, out_ref, valid_v)


def cbow_prepare_params(emb_table, out_weight, context_size, dtype=jnp.float32):
    """One-time parameter prep (hoisted out of the per-call forward).

    emb_table:  (V, D) nn.Embedding weight.
    out_weight: (V, D) nn.Linear weight (PyTorch layout).
    Returns (emb_padded (V_pad, D), wt_padded (D, V_pad), V).  The 1/C mean
    scale is folded into the transposed Linear weight, so params are tied to
    this context_size."""
    V, D = emb_table.shape
    V_pad = _round_up(V, 128)
    emb_p = jnp.zeros((V_pad, D), dtype).at[:V, :].set(emb_table.astype(dtype))
    wt_p = jnp.zeros((D, V_pad), dtype).at[:, :V].set(
        (out_weight.T / float(context_size)).astype(dtype))
    return emb_p, wt_p, V


def cbow_forward(inputs, emb_padded, wt_padded, valid_v, *, path="auto"):
    """inputs: (B, C) int32 token ids; emb_padded/wt_padded from
    cbow_prepare_params.  Returns (B, V) f32 log-probabilities."""
    B, C = inputs.shape
    V_pad, D = emb_padded.shape
    assert wt_padded.shape == (D, V_pad)

    B_pad = _round_up(B, 8)
    idx_p = jnp.zeros((B_pad, C), jnp.int32).at[:B, :].set(inputs.astype(jnp.int32))

    if path == "auto":
        path = "counts" if V_pad <= _COUNTS_VOCAB_LIMIT else "gather"

    if path == "counts":
        kernel = functools.partial(_cbow_kernel_counts, valid_v=valid_v)
        idx_space = pltpu.MemorySpace.VMEM
    elif path == "gather":
        kernel = functools.partial(_cbow_kernel_gather, valid_v=valid_v, valid_b=B)
        idx_space = pltpu.MemorySpace.SMEM
    else:
        raise ValueError(f"unknown path: {path}")

    out_p = pl.pallas_call(
        kernel,
        out_shape=jax.ShapeDtypeStruct((B_pad, V_pad), jnp.float32),
        in_specs=[
            pl.BlockSpec(memory_space=idx_space),                 # token ids
            pl.BlockSpec(memory_space=pltpu.MemorySpace.VMEM),    # embedding
            pl.BlockSpec(memory_space=pltpu.MemorySpace.VMEM),    # (D, V_pad) weight
        ],
        out_specs=pl.BlockSpec(memory_space=pltpu.MemorySpace.VMEM),
        compiler_params=pltpu.CompilerParams(
            vmem_limit_bytes=_vmem_limit_bytes()),
    )(idx_p, emb_padded, wt_padded)

    return out_p[:B, :valid_v]


if __name__ == "__main__":
    VOCAB = 64
    EMB_DIM = 32
    BATCH = 4
    CONTEXT = 8

    key = jax.random.PRNGKey(0)
    k_idx, k_emb, k_out = jax.random.split(key, 3)

    # deterministic parameter init (shapes match nn.Embedding / nn.Linear)
    emb_table = jax.random.normal(k_emb, (VOCAB, EMB_DIM), dtype=jnp.float32)
    out_weight = jax.random.normal(k_out, (VOCAB, EMB_DIM), dtype=jnp.float32) * 0.1
    inputs = jax.random.randint(k_idx, (BATCH, CONTEXT), 0, VOCAB, dtype=jnp.int32)

    # one-time parameter prep (padding / cast / transpose / 1/C fold)
    emb_p, wt_p, valid_v = cbow_prepare_params(emb_table, out_weight, CONTEXT)

    # reference in plain JAX (matches the PyTorch forward semantics)
    ref_hidden = jnp.take(emb_table, inputs, axis=0).mean(axis=1)
    ref = jax.nn.log_softmax(ref_hidden @ out_weight.T, axis=1)

    ok = True
    for path in ("counts", "gather"):   # exercise both statically-selected paths
        log_probs = cbow_forward(inputs, emb_p, wt_p, valid_v, path=path)
        jax.block_until_ready(log_probs)
        assert log_probs.shape == (BATCH, VOCAB)
        ok = ok and bool(jnp.allclose(log_probs, ref, atol=1e-5, rtol=1e-5))

    assert ok
    print("KERNEL_OK")
</pallas_src>

<mosaic_0001>
module attributes {stable_mosaic.version = 11 : i64} {
  func.func @_cbow_kernel_counts(%arg0: memref<8x8xi32, #tpu.memory_space<vmem>>, %arg1: memref<128x32xf32, #tpu.memory_space<vmem>>, %arg2: memref<32x128xf32, #tpu.memory_space<vmem>>, %arg3: memref<8x128xf32, #tpu.memory_space<vmem>>) attributes {dimension_semantics = [], scalar_prefetch = 0 : i64, scratch_operands = 0 : i64, tpu.core_type = #tpu.core_type<tc>} {
    %c0 = arith.constant 0 : index
    %c0_0 = arith.constant 0 : index
    %0 = vector.load %arg0[%c0, %c0_0] : memref<8x8xi32, #tpu.memory_space<vmem>>, vector<8x8xi32>
    %1 = tpu.iota {dimensions = array<i32: 1>} : vector<8x128xi32>
    %cst = arith.constant 0.000000e+00 : f32
    %2 = vector.broadcast %cst : f32 to vector<8x128xf32>
    %3 = vector.extract_strided_slice %0 {offsets = [0, 0], sizes = [8, 1], strides = [1, 1]} : vector<8x8xi32> to vector<8x1xi32>
    %4 = vector.broadcast %3 : vector<8x1xi32> to vector<8x128xi32>
    %5 = arith.cmpi eq, %1, %4 : vector<8x128xi32>
    %6 = arith.extui %5 : vector<8x128xi1> to vector<8x128xi32>
    %7 = arith.sitofp %6 : vector<8x128xi32> to vector<8x128xf32>
    %8 = arith.addf %2, %7 : vector<8x128xf32>
    %9 = vector.extract_strided_slice %0 {offsets = [0, 1], sizes = [8, 1], strides = [1, 1]} : vector<8x8xi32> to vector<8x1xi32>
    %10 = vector.broadcast %9 : vector<8x1xi32> to vector<8x128xi32>
    %11 = arith.cmpi eq, %1, %10 : vector<8x128xi32>
    %12 = arith.extui %11 : vector<8x128xi1> to vector<8x128xi32>
    %13 = arith.sitofp %12 : vector<8x128xi32> to vector<8x128xf32>
    %14 = arith.addf %8, %13 : vector<8x128xf32>
    %15 = vector.extract_strided_slice %0 {offsets = [0, 2], sizes = [8, 1], strides = [1, 1]} : vector<8x8xi32> to vector<8x1xi32>
    %16 = vector.broadcast %15 : vector<8x1xi32> to vector<8x128xi32>
    %17 = arith.cmpi eq, %1, %16 : vector<8x128xi32>
    %18 = arith.extui %17 : vector<8x128xi1> to vector<8x128xi32>
    %19 = arith.sitofp %18 : vector<8x128xi32> to vector<8x128xf32>
    %20 = arith.addf %14, %19 : vector<8x128xf32>
    %21 = vector.extract_strided_slice %0 {offsets = [0, 3], sizes = [8, 1], strides = [1, 1]} : vector<8x8xi32> to vector<8x1xi32>
    %22 = vector.broadcast %21 : vector<8x1xi32> to vector<8x128xi32>
    %23 = arith.cmpi eq, %1, %22 : vector<8x128xi32>
    %24 = arith.extui %23 : vector<8x128xi1> to vector<8x128xi32>
    %25 = arith.sitofp %24 : vector<8x128xi32> to vector<8x128xf32>
    %26 = arith.addf %20, %25 : vector<8x128xf32>
    %27 = vector.extract_strided_slice %0 {offsets = [0, 4], sizes = [8, 1], strides = [1, 1]} : vector<8x8xi32> to vector<8x1xi32>
    %28 = vector.broadcast %27 : vector<8x1xi32> to vector<8x128xi32>
    %29 = arith.cmpi eq, %1, %28 : vector<8x128xi32>
    %30 = arith.extui %29 : vector<8x128xi1> to vector<8x128xi32>
    %31 = arith.sitofp %30 : vector<8x128xi32> to vector<8x128xf32>
    %32 = arith.addf %26, %31 : vector<8x128xf32>
    %33 = vector.extract_strided_slice %0 {offsets = [0, 5], sizes = [8, 1], strides = [1, 1]} : vector<8x8xi32> to vector<8x1xi32>
    %34 = vector.broadcast %33 : vector<8x1xi32> to vector<8x128xi32>
    %35 = arith.cmpi eq, %1, %34 : vector<8x128xi32>
    %36 = arith.extui %35 : vector<8x128xi1> to vector<8x128xi32>
    %37 = arith.sitofp %36 : vector<8x128xi32> to vector<8x128xf32>
    %38 = arith.addf %32, %37 : vector<8x128xf32>
    %39 = vector.extract_strided_slice %0 {offsets = [0, 6], sizes = [8, 1], strides = [1, 1]} : vector<8x8xi32> to vector<8x1xi32>
    %40 = vector.broadcast %39 : vector<8x1xi32> to vector<8x128xi32>
    %41 = arith.cmpi eq, %1, %40 : vector<8x128xi32>
    %42 = arith.extui %41 : vector<8x128xi1> to vector<8x128xi32>
    %43 = arith.sitofp %42 : vector<8x128xi32> to vector<8x128xf32>
    %44 = arith.addf %38, %43 : vector<8x128xf32>
    %45 = vector.extract_strided_slice %0 {offsets = [0, 7], sizes = [8, 1], strides = [1, 1]} : vector<8x8xi32> to vector<8x1xi32>
    %46 = vector.broadcast %45 : vector<8x1xi32> to vector<8x128xi32>
    %47 = arith.cmpi eq, %1, %46 : vector<8x128xi32>
    %48 = arith.extui %47 : vector<8x128xi1> to vector<8x128xi32>
    %49 = arith.sitofp %48 : vector<8x128xi32> to vector<8x128xf32>
    %50 = arith.addf %44, %49 : vector<8x128xf32>
    %c0_1 = arith.constant 0 : index
    %c0_2 = arith.constant 0 : index
    %51 = vector.load %arg1[%c0_1, %c0_2] : memref<128x32xf32, #tpu.memory_space<vmem>>, vector<128x32xf32>
    %cst_3 = arith.constant dense<0.000000e+00> : vector<8x32xf32>
    %52 = tpu.matmul %50, %51, %cst_3 {dimension_numbers = #tpu.dot_dimension_numbers<[1], [0], [0], [1], [0, 0, 1, 1], [], []>} : vector<8x128xf32>, vector<128x32xf32>, vector<8x32xf32> -> vector<8x32xf32>
    %c0_4 = arith.constant 0 : index
    %c0_5 = arith.constant 0 : index
    %53 = vector.load %arg2[%c0_4, %c0_5] : memref<32x128xf32, #tpu.memory_space<vmem>>, vector<32x128xf32>
    %cst_6 = arith.constant dense<0.000000e+00> : vector<8x128xf32>
    %54 = tpu.matmul %52, %53, %cst_6 {dimension_numbers = #tpu.dot_dimension_numbers<[1], [0], [0], [1], [0, 0, 1, 1], [], []>} : vector<8x32xf32>, vector<32x128xf32>, vector<8x128xf32> -> vector<8x128xf32>
    %55 = tpu.iota {dimensions = array<i32: 1>} : vector<8x128xi32>
    %c64_i32 = arith.constant 64 : i32
    %56 = vector.broadcast %c64_i32 : i32 to vector<8x128xi32>
    %57 = arith.cmpi slt, %55, %56 : vector<8x128xi32>
    %cst_7 = arith.constant -1.000000e+30 : f32
    %58 = vector.broadcast %cst_7 : f32 to vector<8x128xf32>
    %59 = arith.select %57, %54, %58 : vector<8x128xi1>, vector<8x128xf32>
    %cst_8 = arith.constant dense<0xFF800000> : vector<8xf32>
    %60 = vector.multi_reduction <maximumf>, %59, %cst_8 [1] : vector<8x128xf32> to vector<8xf32>
    %61 = vector.shape_cast %60 : vector<8xf32> to vector<8x1xf32>
    %62 = vector.broadcast %61 : vector<8x1xf32> to vector<8x128xf32>
    %63 = arith.subf %59, %62 : vector<8x128xf32>
    %64 = math.exp %63 : vector<8x128xf32>
    %cst_9 = arith.constant dense<0.000000e+00> : vector<8xf32>
    %65 = vector.multi_reduction <add>, %64, %cst_9 [1] : vector<8x128xf32> to vector<8xf32>
    %66 = vector.shape_cast %65 : vector<8xf32> to vector<8x1xf32>
    %67 = math.log %66 : vector<8x1xf32>
    %68 = vector.broadcast %67 : vector<8x1xf32> to vector<8x128xf32>
    %69 = arith.subf %63, %68 : vector<8x128xf32>
    %c0_10 = arith.constant 0 : index
    %c0_11 = arith.constant 0 : index
    %70 = vector.load %arg3[%c0_10, %c0_11] : memref<8x128xf32, #tpu.memory_space<vmem>>, vector<8x128xf32>
    tpu.vector_store %arg3[%c0_10, %c0_11], %69 {strides = array<i32>} : memref<8x128xf32, #tpu.memory_space<vmem>>, vector<8x128xf32>,
    return
  }
}

</mosaic_0001>

<bundles_post_ra>
// kernel: tpu_custom_call.1
= control target key start
LH: loop header
LB: loop body
LE: loop exit
PB: predicated region body
PF: predicated region fallthrough
CT: control target
= control target key end

     0   :  { %v421_v2 = vmov 2   ;;  %v422_v3 = vmov 0   ;;  %v423_v8 = vmov 0.0|0.0   ;;  %s538_s0 = inlined_call_operand.vmem [shape: s32[8,8], index: 0, kind: input, shape index: {}]   ;;  %s539_s1 = inlined_call_operand.vmem [shape: f32[128,32], index: 1, kind: input, shape index: {}]   ;;  %s540_s2 = inlined_call_operand.vmem [shape: f32[32,128], index: 2, kind: input, shape index: {}]   ;;  %s541_s3 = inlined_call_operand.hbm [shape: f32[8,128], index: 3, kind: output, shape index: {}]  }
   0x1   :  { %v15_v0 = vld [vmem:[%s538_s0] sm:$0xff]  ;;  %386 = vset.pattern.permute.xlu1 %v421_v2  ;;  %384 = vset.pattern.permute.xlu0 %v422_v3  ;;  %v75_v4 = vld [vmem:[%s539_s1 + $0x8] sm:$0xff]  ;;  %v76_v5 = vld [vmem:[%s539_s1 + $0x10] sm:$0xff] }
   0x2   :  { %v74_v1 = vld [vmem:[%s539_s1] sm:$0xff]  ;;  %33 = vperm.xlu1 %386, %v15_v0   ;;  %19 = vperm.xlu0 %384, %v15_v0   ;;  %v77_v7 = vld [vmem:[%s539_s1 + $0x18] sm:$0xff] }
   0x3   :  { %v343_v6 = vpack.c.bf16 %v75_v4, %v74_v1  ;;  %342 = vmatprep.subr.bf16.mxu0 %v423_v8  ;;  %366 = vmatprep.subr.bf16.mxu1 %v423_v8 }
   0x4   :  { %8 = vsyncpa [#allocation3], 0  ;;  %v346_v9 = vpack.c.bf16 %v77_v7, %v76_v5  ;;  %v424_v10 = vmov 3   ;;  %v425_v11 = vmov 1   ;;  %v78_v12 = vld [vmem:[%s539_s1 + $0x20] sm:$0xff]  ;;  %v79_v13 = vld [vmem:[%s539_s1 + $0x28] sm:$0xff]  ;;  %v16_v41 = vlaneseq }
   0x5   :  { %344 = vmatpush3.bf16.msra.mxu0 %v343_v6  ;;  %v349_v14 = vpack.c.bf16 %v79_v13, %v78_v12  ;;  %v80_v15 = vld [vmem:[%s539_s1 + $0x30] sm:$0xff]  ;;  %v81_v16 = vld [vmem:[%s539_s1 + $0x38] sm:$0xff]  ;;  %v426_v17 = vmov 4   ;;  %v427_v18 = vmov 5   ;;  %v82_v20 = vld [vmem:[%s539_s1 + $0x40] sm:$0xff]  ;;  %v428_v22 = vmov 6  }
   0x6   :  { %345 = vmatprep.subr.bf16.mxu0 %v423_v8  ;;  %387 = vset.pattern.permute.xlu1 %v424_v10  ;;  %v352_v19 = vpack.c.bf16 %v81_v16, %v80_v15  ;;  %v83_v21 = vld [vmem:[%s539_s1 + $0x48] sm:$0xff]  ;;  %v429_v23 = vmov 7   ;;  %v84_v25 = vld [vmem:[%s539_s1 + $0x50] sm:$0xff]  ;;  %v85_v26 = vld [vmem:[%s539_s1 + $0x58] sm:$0xff]  ;;  %vm430_vm0 = vmmov 0   ;;  %v431_v33 = vmov 0.0  }
   0x7   :  { %385 = vset.pattern.permute.xlu0 %v425_v11  ;;  %40 = vperm.xlu1 %387, %v15_v0   ;;  %v355_v24 = vpack.c.bf16 %v83_v21, %v82_v20  ;;  %v358_v27 = vpack.c.bf16 %v85_v26, %v84_v25  ;;  %v86_v28 = vld [vmem:[%s539_s1 + $0x60] sm:$0xff]  ;;  %v87_v29 = vld [vmem:[%s539_s1 + $0x68] sm:$0xff]  ;;  %v88_v31 = vld [vmem:[%s539_s1 + $0x70] sm:$0xff]  ;;  %v17_v44 = vand.u32 127, %v16_v41  ;;  %vm164_vm9 = vcmask 261120  }
   0x8   :  { %26 = vperm.xlu0 %385, %v15_v0   ;;  %v361_v30 = vpack.c.bf16 %v87_v29, %v86_v28  ;;  %v89_v32 = vld [vmem:[%s539_s1 + $0x78] sm:$0xff]  ;;  %328 = vmatprep.mubr.msk.f32.mxu0 %vm430_vm0, %v431_v33  ;;  %v160_v34 = vld [vmem:[%s540_s2] sm:$0xff]  ;;  %v161_v35 = vld [vmem:[%s540_s2 + $0x8] sm:$0xff] }
   0x9   :  { %347 = vmatpush3.bf16.msra.mxu0 %v346_v9  ;;  %v162_v36 = vld [vmem:[%s540_s2 + $0x10] sm:$0xff]  ;;  %339 = vmatprep.mubr.msk.f32.mxu1 %vm430_vm0, %v431_v33  ;;  %v367_v37 = vpack.c.bf16 %v161_v35, %v160_v34  ;;  %v163_v38 = vld [vmem:[%s540_s2 + $0x18] sm:$0xff]  ;;  %v364_v39 = vpack.c.bf16 %v89_v32, %v88_v31  ;;  %vm238_vm10 = vcmp.lt.s32.totalorder %v17_v44, 64  ;;  %s432_s2 = smov [#allocation2]  }
   0xa   :  { %348 = vmatprep.subr.bf16.mxu0 %v423_v8  ;;  %v370_v40 = vpack.c.bf16 %v163_v38, %v162_v36  ;;  %s257_s24 = sshll.u32 %s432_s2, 4  ;;  %s258_s24 = int_to_ptr.vmem [resolvable:$true] %s257_s24 }
   0xb   :  { %388 = vset.pattern.permute.xlu1 %v426_v17  ;;  %368 = vmatpush3.bf16.msra.mxu1 %v367_v37  ;;  %s397_s25 = scalar_lea.vmem %s258_s24, 128  ;;  %p402_p1 = scmp.lt.s32.totalorder %s258_s24, %s258_s24 }
   0xc   :  { %389 = vset.pattern.permute.xlu0 %v427_v18  ;;  %47 = vperm.xlu1 %388, %v15_v0   ;;  %p398_p0 = scmp.ne.s32.totalorder %s258_s24, %s397_s25  ;;  %p403_p2 = scmp.lt.s32.totalorder %s397_s25, %s397_s25 }
   0xd   :  { %54 = vperm.xlu0 %389, %v15_v0   ;;  %350 = vmatpush3.bf16.msra.mxu0 %v349_v14 }
   0xe   :  { %351 = vmatprep.subr.bf16.mxu0 %v423_v8  ;;  %369 = vmatprep.subr.bf16.mxu1 %v423_v8  ;;  %p404_p3 = por %p403_p2, %p402_p1 }
   0xf   :  { %371 = vmatpush3.bf16.msra.mxu1 %v370_v40 }
  0x10   :  { %390 = vset.pattern.permute.xlu1 %v428_v22  ;;  %p405_p4 = pnand %p404_p3, %p398_p0 }
  0x11   :  { %392 = vset.pattern.permute.xlu0 %v429_v23  ;;  %61 = vperm.xlu1 %390, %v15_v0  }
  0x12   :  { %353 = vmatpush3.bf16.msra.mxu0 %v352_v19 }
  0x13   :  { %354 = vmatprep.subr.bf16.mxu0 %v423_v8 }
  0x15   :  { %391 = vset.pattern.permute.xlu1 %v429_v23 }
  0x16   :  { %356 = vmatpush3.bf16.msra.mxu0 %v355_v24  ;;  %68 = vperm.xlu1 %391, %v15_v0  }
  0x17   :  { %357 = vmatprep.subr.bf16.mxu0 %v423_v8 }
  0x1a   :  { %359 = vmatpush3.bf16.msra.mxu0 %v358_v27 }
  0x1b   :  { %360 = vmatprep.subr.bf16.mxu0 %v423_v8 }
  0x1e   :  { %362 = vmatpush3.bf16.msra.mxu0 %v361_v30 }
  0x1f   :  { %363 = vmatprep.subr.bf16.mxu0 %v423_v8 }
  0x22   :  { %365 = vmatpush3.bf16.msra.mxu0 %v364_v39 }
  0x81   :  { %v34_v42 = vpop.permute.xlu1 %33  ;;  %v20_v43 = vpop.permute.xlu0 %19 }
  0x82   :  { %vm21_vm1 = vcmp.eq.s32.totalorder %v17_v44, %v20_v43  ;;  %vm35_vm2 = vcmp.eq.s32.totalorder %v17_v44, %v34_v42 }
  0x83   :  { %v265_v47 = vsel %vm21_vm1, 1.0, %v431_v33  ;;  %v267_v50 = vsel %vm35_vm2, 1.0, %v431_v33 }
  0x86   :  { %v41_v45 = vpop.permute.xlu1 %40 }
  0x87   :  { %v27_v46 = vpop.permute.xlu0 %26  ;;  %vm42_vm4 = vcmp.eq.s32.totalorder %v17_v44, %v41_v45 }
  0x88   :  { %vm28_vm3 = vcmp.eq.s32.totalorder %v17_v44, %v27_v46  ;;  %v268_v54 = vsel %vm42_vm4, 1.0, %v431_v33 }
  0x89   :  { %v266_v48 = vsel %vm28_vm3, 1.0, %v431_v33 }
  0x8a   :  { %v31_v49 = vadd.f32 %v266_v48, %v265_v47 }
  0x8b   :  { %v48_v52 = vpop.permute.xlu1 %47 }
  0x8c   :  { %v38_v51 = vadd.f32 %v267_v50, %v31_v49  ;;  %v55_v53 = vpop.permute.xlu0 %54  ;;  %vm49_vm5 = vcmp.eq.s32.totalorder %v17_v44, %v48_v52 }
  0x8d   :  { %vm56_vm6 = vcmp.eq.s32.totalorder %v17_v44, %v55_v53  ;;  %v269_v56 = vsel %vm49_vm5, 1.0, %v431_v33 }
  0x8e   :  { %v45_v55 = vadd.f32 %v268_v54, %v38_v51  ;;  %v270_v58 = vsel %vm56_vm6, 1.0, %v431_v33 }
  0x90   :  { %v52_v57 = vadd.f32 %v269_v56, %v45_v55  ;;  %v62_v59 = vpop.permute.xlu1 %61 }
  0x91   :  { %vm63_vm7 = vcmp.eq.s32.totalorder %v17_v44, %v62_v59 }
  0x92   :  { %v59_v60 = vadd.f32 %v270_v58, %v52_v57  ;;  %v271_v61 = vsel %vm63_vm7, 1.0, %v431_v33 }
  0x94   :  { %v66_v63 = vadd.f32 %v271_v61, %v59_v60 }
  0x95   :  { %v69_v62 = vpop.permute.xlu1 %68 }
  0x96   :  { %vm70_vm8 = vcmp.eq.s32.totalorder %v17_v44, %v69_v62 }
  0x97   :  { %v272_v0 = vsel %vm70_vm8, 1.0, %v431_v33 }
  0x98   :  { %v73_v1 = vadd.f32 %v272_v0, %v66_v63 }
  0x9a   :  { %329 = vmatmul.mubr.f32.vlgmr.msra.gmra.mrb[0].mxu0 %v73_v1 }
 0x16d   :  { %v156_v2 = vpop.f32.mrb[0].mxu0 }
 0x16e   :  { %v330_v3 = vpop.f32.mrb[1].mxu0  ;;  %340 = vmatmul.mubr.msk.f32.vlgmr.msra.gmra.mrb[0].mxu1 %vm164_vm9, %v156_v2 }
 0x241   :  { %v234_v4 = vpop.f32.mrb[0].mxu1 }
 0x242   :  { %v341_v5 = vpop.f32.mrb[1].mxu1  ;;  %v239_v6 = vsel %vm238_vm10, %v234_v4, -1e+30 }
 0x243   :  { %240 = vmax.xlane.f32.xlu0 %v239_v6 }
 0x2d0   :  { %v241_v7 = vpop.xlane.xlu0 %240 }
 0x2d1   :  { %v242_v8 = vsub.f32 %v239_v6, %v241_v7 }
 0x2d3   :  { %v243_v9 = vmul.f32 1.442695, %v242_v8 }
 0x2d5   :  { %393 = vpow2.f32 %v243_v9 }
 0x2df   :  { %v394_v10 = vpop.eup %393 }
 0x2e0   :  { %245 = vadd.xlane.f32.xlu1 %v394_v10 }
 0x36d   :  { %v246_v11 = vpop.xlane.xlu1 %245 }
 0x36e   :  { %395 = vlog2.f32 %v246_v11 }
 0x378   :  { %v396_v12 = vpop.eup %395 }
 0x379   :  { %v248_v13 = vmul.f32 0.6931472, %v396_v12 }
 0x37b   :  { %v249_v14 = vsub.f32 %v242_v8, %v248_v13 }
 0x37d   :  { %250 = vst [vmem:[#allocation2] sm:$0xff] %v249_v14 }
 0x37e   :  { %408 = shalt.err (!%p405_p4)
}
 0x37f   :  { %s409_s28 = scalar_lea.hbm %s541_s3, 128 }
 0x380   :  { %p410_p5 = scmp.ne.s32.totalorder %s541_s3, %s409_s28  ;;  %p413_p6 = scmp.lt.u32.totalorder %s409_s28, %s541_s3 }
 0x382   :  { %p415_p7 = pnand %p413_p6, %p410_p5 }
 0x384   :  { %418 = shalt.err (!%p415_p7)
}
 0x385   :  { %260 = dma.vmem_to_hbm [thread:$0]  %s258_s24, 128, %s541_s3, [#allocation3]  }
 0x386   :  { %419 = dma.done.wait [#allocation3], 128  }
 0x387   :  { %420 = vsyncadd [#allocation3], 4294967168 }
 0x388   :  { %264 = vsyncpa [#allocation3], 1 }

</bundles_post_ra>
